<compile_context>
chip_gen: v5e
topology: v5e:2x2
jax: 0.10.0
libtpu: 0.0.40
codegen_flags: <defaults>
</compile_context>

<pallas_src>
import jax
import jax.numpy as jnp
from jax.experimental import pallas as pl
from jax.experimental.pallas import tpu as pltpu

D_IN, HIDDEN, D_OUT = 8, 32, 4


def fcsmall_kernel(x_ref, w1_ref, b1_ref, w2_ref, b2_ref, w3_ref, b3_ref, o_ref):
    # x_ref: [D_in, TN] bf16 (batch on lanes); w*: [out, in] bf16; b*: [out, 1] f32.
    x = x_ref[...]

    # layer 1: Linear + ReLU   (MXU in bf16, accumulate f32, elementwise f32)
    h1 = jnp.dot(w1_ref[...], x, preferred_element_type=jnp.float32) + b1_ref[...]
    h1 = jnp.maximum(h1, 0.0)

    # layer 2: Linear + ReLU
    h2 = jnp.dot(w2_ref[...], h1.astype(jnp.bfloat16),
                 preferred_element_type=jnp.float32) + b2_ref[...]
    h2 = jnp.maximum(h2, 0.0)

    # layer 3: Linear (no activation; ModelBuilder's Sigmoid is unused in forward)
    out = jnp.dot(w3_ref[...], h2.astype(jnp.bfloat16),
                  preferred_element_type=jnp.float32) + b3_ref[...]

    o_ref[...] = out.astype(o_ref.dtype)   # [D_out, TN] — lane-dense store


def model_builder_forward(x, params, *, tn=1024):
    """Pallas-kernel equivalent of ModelBuilder.forward(x).

    x: [N, D_in] f32 (PyTorch layout).  params: W [out, in] f32, b [out, 1] f32.
    Returns [N, D_out] f32.
    """
    w1, b1, w2, b2, w3, b3 = params
    n, d_in = x.shape
    hidden = w1.shape[0]
    d_out = w3.shape[0]

    # Batch tile: multiple of 128 lanes; don't over-pad tiny batches.
    tn = min(tn, 128 * pl.cdiv(n, 128))
    n_pad = tn * pl.cdiv(n, tn)

    # Wrapper-side layout plumbing: batch -> lanes, MXU inputs -> bf16.
    x_t = jnp.pad(x, ((0, n_pad - n), (0, 0))).T.astype(jnp.bfloat16)   # [D_in, Np]
    w1b = w1.astype(jnp.bfloat16)
    w2b = w2.astype(jnp.bfloat16)
    w3b = w3.astype(jnp.bfloat16)

    # Resident (constant-index) spec for the tiny weight/bias arrays.
    resident = lambda a: pl.BlockSpec(a.shape, lambda i: (0, 0))

    flops = 2 * n_pad * (d_in * hidden + hidden * hidden + hidden * d_out)
    bytes_accessed = (x_t.size * 2 + n_pad * d_out * 4
                      + sum(int(p.size) * p.dtype.itemsize for p in params))

    out_t = pl.pallas_call(
        fcsmall_kernel,
        out_shape=jax.ShapeDtypeStruct((d_out, n_pad), jnp.float32),
        grid=(n_pad // tn,),
        in_specs=[
            pl.BlockSpec((d_in, tn), lambda i: (0, i)),   # x tile, double-buffered
            resident(w1b), resident(b1),
            resident(w2b), resident(b2),
            resident(w3b), resident(b3),
        ],
        out_specs=pl.BlockSpec((d_out, tn), lambda i: (0, i)),
        compiler_params=pltpu.CompilerParams(
            dimension_semantics=("parallel",)),           # split batch tiles over v7x's 2 TCs
        cost_estimate=pl.CostEstimate(flops=flops, transcendentals=0,
                                      bytes_accessed=bytes_accessed),
    )(x_t, w1b, b1, w2b, b2, w3b, b3)

    # Back to PyTorch output layout [N, D_out].
    return out_t[:, :n].T


def init_params(key, d_in=D_IN, hidden=HIDDEN, d_out=D_OUT):
    """PyTorch-Linear-style init: W [out, in], b [out, 1], U(-1/sqrt(fan_in), +1/sqrt(fan_in))."""
    def linear(k, fan_in, fan_out):
        kw, kb = jax.random.split(k)
        bound = 1.0 / jnp.sqrt(jnp.float32(fan_in))
        w = jax.random.uniform(kw, (fan_out, fan_in), jnp.float32, -bound, bound)
        b = jax.random.uniform(kb, (fan_out, 1), jnp.float32, -bound, bound)
        return w, b

    k1, k2, k3 = jax.random.split(key, 3)
    w1, b1 = linear(k1, d_in, hidden)
    w2, b2 = linear(k2, hidden, hidden)
    w3, b3 = linear(k3, hidden, d_out)
    return w1, b1, w2, b2, w3, b3


def reference_forward(x, params):
    """Pure-JAX reference with the same bf16-operand / f32-accumulate numerics."""
    w1, b1, w2, b2, w3, b3 = params
    bf = jnp.bfloat16
    h1 = jnp.maximum(
        jnp.dot(x.astype(bf), w1.astype(bf).T, preferred_element_type=jnp.float32) + b1.T, 0.0)
    h2 = jnp.maximum(
        jnp.dot(h1.astype(bf), w2.astype(bf).T, preferred_element_type=jnp.float32) + b2.T, 0.0)
    return jnp.dot(h2.astype(bf), w3.astype(bf).T, preferred_element_type=jnp.float32) + b3.T


if __name__ == "__main__":
    key = jax.random.PRNGKey(0)
    kx, kp = jax.random.split(key)

    N = 256   # small demo batch; multiple of 128 so the lane-dense tiling is exercised
    x = jax.random.normal(kx, (N, D_IN), dtype=jnp.float32)
    params = init_params(kp)

    out = jax.block_until_ready(model_builder_forward(x, params))
    ref = reference_forward(x, params)

    assert out.shape == (N, D_OUT)
    assert jnp.allclose(out, ref, atol=1e-3, rtol=1e-3), "mismatch vs pure-JAX reference"

    print("KERNEL_OK")
</pallas_src>

<mosaic_0001>
module attributes {stable_mosaic.version = 11 : i64} {
  func.func @fcsmall_kernel(%arg0: i32, %arg1: memref<8x256xbf16, #tpu.memory_space<vmem>>, %arg2: memref<32x8xbf16, #tpu.memory_space<vmem>>, %arg3: memref<32x1xf32, #tpu.memory_space<vmem>>, %arg4: memref<32x32xbf16, #tpu.memory_space<vmem>>, %arg5: memref<32x1xf32, #tpu.memory_space<vmem>>, %arg6: memref<4x32xbf16, #tpu.memory_space<vmem>>, %arg7: memref<4x1xf32, #tpu.memory_space<vmem>>, %arg8: memref<4x256xf32, #tpu.memory_space<vmem>>) attributes {dimension_semantics = [#tpu.dimension_semantics<parallel>], iteration_bounds = array<i64: 1>, scalar_prefetch = 0 : i64, scratch_operands = 0 : i64, tpu.core_type = #tpu.core_type<tc>, window_params = [{transform_indices = @transform_0, window_bounds = array<i64: 8, 256>}, {pipeline_mode = #tpu.pipeline_mode<synchronous>, transform_indices = @transform_1, window_bounds = array<i64: 32, 8>}, {pipeline_mode = #tpu.pipeline_mode<synchronous>, transform_indices = @transform_2, window_bounds = array<i64: 32, 1>}, {pipeline_mode = #tpu.pipeline_mode<synchronous>, transform_indices = @transform_3, window_bounds = array<i64: 32, 32>}, {pipeline_mode = #tpu.pipeline_mode<synchronous>, transform_indices = @transform_4, window_bounds = array<i64: 32, 1>}, {pipeline_mode = #tpu.pipeline_mode<synchronous>, transform_indices = @transform_5, window_bounds = array<i64: 4, 32>}, {pipeline_mode = #tpu.pipeline_mode<synchronous>, transform_indices = @transform_6, window_bounds = array<i64: 4, 1>}, {transform_indices = @transform_7, window_bounds = array<i64: 4, 256>}]} {
    %c0 = arith.constant 0 : index
    %c0_0 = arith.constant 0 : index
    %0 = vector.load %arg1[%c0, %c0_0] : memref<8x256xbf16, #tpu.memory_space<vmem>>, vector<8x256xbf16>
    %c0_1 = arith.constant 0 : index
    %c0_2 = arith.constant 0 : index
    %1 = vector.load %arg2[%c0_1, %c0_2] : memref<32x8xbf16, #tpu.memory_space<vmem>>, vector<32x8xbf16>
    %cst = arith.constant dense<0.000000e+00> : vector<32x256xf32>
    %2 = tpu.matmul %1, %0, %cst {dimension_numbers = #tpu.dot_dimension_numbers<[1], [0], [0], [1], [0, 0, 1, 1], [], []>} : vector<32x8xbf16>, vector<8x256xbf16>, vector<32x256xf32> -> vector<32x256xf32>
    %c0_3 = arith.constant 0 : index
    %c0_4 = arith.constant 0 : index
    %3 = vector.load %arg3[%c0_3, %c0_4] : memref<32x1xf32, #tpu.memory_space<vmem>>, vector<32x1xf32>
    %4 = vector.broadcast %3 : vector<32x1xf32> to vector<32x256xf32>
    %5 = arith.addf %2, %4 : vector<32x256xf32>
    %cst_5 = arith.constant 0.000000e+00 : f32
    %6 = vector.broadcast %cst_5 : f32 to vector<32x256xf32>
    %7 = arith.maximumf %5, %6 : vector<32x256xf32>
    %c0_6 = arith.constant 0 : index
    %c0_7 = arith.constant 0 : index
    %8 = vector.load %arg4[%c0_6, %c0_7] : memref<32x32xbf16, #tpu.memory_space<vmem>>, vector<32x32xbf16>
    %9 = arith.truncf %7 : vector<32x256xf32> to vector<32x256xbf16>
    %cst_8 = arith.constant dense<0.000000e+00> : vector<32x256xf32>
    %10 = tpu.matmul %8, %9, %cst_8 {dimension_numbers = #tpu.dot_dimension_numbers<[1], [0], [0], [1], [0, 0, 1, 1], [], []>} : vector<32x32xbf16>, vector<32x256xbf16>, vector<32x256xf32> -> vector<32x256xf32>
    %c0_9 = arith.constant 0 : index
    %c0_10 = arith.constant 0 : index
    %11 = vector.load %arg5[%c0_9, %c0_10] : memref<32x1xf32, #tpu.memory_space<vmem>>, vector<32x1xf32>
    %12 = vector.broadcast %11 : vector<32x1xf32> to vector<32x256xf32>
    %13 = arith.addf %10, %12 : vector<32x256xf32>
    %cst_11 = arith.constant 0.000000e+00 : f32
    %14 = vector.broadcast %cst_11 : f32 to vector<32x256xf32>
    %15 = arith.maximumf %13, %14 : vector<32x256xf32>
    %c0_12 = arith.constant 0 : index
    %c0_13 = arith.constant 0 : index
    %16 = vector.load %arg6[%c0_12, %c0_13] : memref<4x32xbf16, #tpu.memory_space<vmem>>, vector<4x32xbf16>
    %17 = arith.truncf %15 : vector<32x256xf32> to vector<32x256xbf16>
    %cst_14 = arith.constant dense<0.000000e+00> : vector<4x256xf32>
    %18 = tpu.matmul %16, %17, %cst_14 {dimension_numbers = #tpu.dot_dimension_numbers<[1], [0], [0], [1], [0, 0, 1, 1], [], []>} : vector<4x32xbf16>, vector<32x256xbf16>, vector<4x256xf32> -> vector<4x256xf32>
    %c0_15 = arith.constant 0 : index
    %c0_16 = arith.constant 0 : index
    %19 = vector.load %arg7[%c0_15, %c0_16] : memref<4x1xf32, #tpu.memory_space<vmem>>, vector<4x1xf32>
    %20 = vector.broadcast %19 : vector<4x1xf32> to vector<4x256xf32>
    %21 = arith.addf %18, %20 : vector<4x256xf32>
    %c0_17 = arith.constant 0 : index
    %c0_18 = arith.constant 0 : index
    %22 = vector.load %arg8[%c0_17, %c0_18] : memref<4x256xf32, #tpu.memory_space<vmem>>, vector<4x256xf32>
    tpu.vector_store %arg8[%c0_17, %c0_18], %21 {strides = array<i32>} : memref<4x256xf32, #tpu.memory_space<vmem>>, vector<4x256xf32>,
    return
  }
  func.func @transform_0(%arg0: i32) -> (i32, i32) {
    %c0_i32 = arith.constant 0 : i32
    %c0_i32_0 = arith.constant 0 : i32
    return %c0_i32, %arg0 : i32, i32
  }
  func.func @transform_1(%arg0: i32) -> (i32, i32) {
    %c0_i32 = arith.constant 0 : i32
    %c0_i32_0 = arith.constant 0 : i32
    %c0_i32_1 = arith.constant 0 : i32
    return %c0_i32, %c0_i32_0 : i32, i32
  }
  func.func @transform_2(%arg0: i32) -> (i32, i32) {
    %c0_i32 = arith.constant 0 : i32
    %c0_i32_0 = arith.constant 0 : i32
    %c0_i32_1 = arith.constant 0 : i32
    return %c0_i32, %c0_i32_0 : i32, i32
  }
  func.func @transform_3(%arg0: i32) -> (i32, i32) {
    %c0_i32 = arith.constant 0 : i32
    %c0_i32_0 = arith.constant 0 : i32
    %c0_i32_1 = arith.constant 0 : i32
    return %c0_i32, %c0_i32_0 : i32, i32
  }
  func.func @transform_4(%arg0: i32) -> (i32, i32) {
    %c0_i32 = arith.constant 0 : i32
    %c0_i32_0 = arith.constant 0 : i32
    %c0_i32_1 = arith.constant 0 : i32
    return %c0_i32, %c0_i32_0 : i32, i32
  }
  func.func @transform_5(%arg0: i32) -> (i32, i32) {
    %c0_i32 = arith.constant 0 : i32
    %c0_i32_0 = arith.constant 0 : i32
    %c0_i32_1 = arith.constant 0 : i32
    return %c0_i32, %c0_i32_0 : i32, i32
  }
  func.func @transform_6(%arg0: i32) -> (i32, i32) {
    %c0_i32 = arith.constant 0 : i32
    %c0_i32_0 = arith.constant 0 : i32
    %c0_i32_1 = arith.constant 0 : i32
    return %c0_i32, %c0_i32_0 : i32, i32
  }
  func.func @transform_7(%arg0: i32) -> (i32, i32) {
    %c0_i32 = arith.constant 0 : i32
    %c0_i32_0 = arith.constant 0 : i32
    return %c0_i32, %arg0 : i32, i32
  }
}

</mosaic_0001>

<bundles_post_ra>
// kernel: tpu_custom_call.1
= control target key start
LH: loop header
LB: loop body
LE: loop exit
PB: predicated region body
PF: predicated region fallthrough
CT: control target
= control target key end

     0   :  { %v350_v4 = vmov 0   ;;  %vm79_vm0 = vcmask 1043456   ;;  %s449_s0 = inlined_call_operand.vmem [shape: bf16[8,256], index: 0, kind: input, shape index: {}]   ;;  %s450_s1 = inlined_call_operand.vmem [shape: bf16[32,8], index: 1, kind: input, shape index: {}]   ;;  %s451_s2 = inlined_call_operand.vmem [shape: f32[32,1], index: 2, kind: input, shape index: {}]   ;;  %s452_s3 = inlined_call_operand.vmem [shape: bf16[32,32], index: 3, kind: input, shape index: {}]   ;;  %s453_s4 = inlined_call_operand.vmem [shape: f32[32,1], index: 4, kind: input, shape index: {}]   ;;  %s454_s5 = inlined_call_operand.vmem [shape: bf16[4,32], index: 5, kind: input, shape index: {}]   ;;  %s455_s6 = inlined_call_operand.vmem [shape: f32[4,1], index: 6, kind: input, shape index: {}]   ;;  %s456_s7 = inlined_call_operand.hbm [shape: f32[4,256], index: 7, kind: output, shape index: {}]  }
   0x1   :  { %v28_v0 = vld [vmem:[%s449_s0] sm:$0xff]  ;;  %v35_v1 = vld [vmem:[%s451_s2 + $0x10] sm:$0xff]  ;;  %322 = vset.pattern.permute.xlu1 %v350_v4  ;;  %321 = vset.pattern.permute.xlu0 %v350_v4 }
   0x2   :  { %v68_v2 = vunpack.c.l.b16 %v28_v0  ;;  %v69_v3 = vunpack.c.h.b16 %v28_v0  ;;  %v33_v5 = vld [vmem:[%s451_s2] sm:$0xff]  ;;  %49 = vperm.xlu0 %321, %v35_v1   ;;  %323 = vset.pattern.permute.xlu2 %v350_v4 }
   0x3   :  { %39 = vperm.xlu1 %322, %v33_v5  }
   0x4   :  { %v70_v6 = vpack.c.b16 %v68_v2, %v68_v2  ;;  %v71_v7 = vpack.c.b16 %v69_v3, %v69_v3 }
   0x5   :  { %12 = vsyncpa [#allocation3], 0  ;;  %v315_v10 = vld [vmem:[%s450_s1] sm:$0xff]  ;;  %vm72_vm1 = vcmask 64512   ;;  %v36_v11 = vld [vmem:[%s451_s2 + $0x18] sm:$0xff]  ;;  %vm174_vm2 = vcmask 261120  }
   0x6   :  { %v81_v8 = vsel %vm79_vm0, %v70_v6, 0  ;;  %v84_v9 = vsel %vm79_vm0, %v71_v7, 0  ;;  %v34_v12 = vld [vmem:[%s451_s2 + $0x8] sm:$0xff]  ;;  %v140_v13 = vld [vmem:[%s453_s4] sm:$0xff]  ;;  %v142_v25 = vld [vmem:[%s453_s4 + $0x10] sm:$0xff]  ;;  %s351_s25 = smov [#allocation2]  }
   0x7   :  { %93 = vmatpush.bf16.msra.mxu0 %v81_v8  ;;  %112 = vmatpush.bf16.msra.mxu1 %v84_v9  ;;  %v141_v14 = vld [vmem:[%s453_s4 + $0x8] sm:$0xff]  ;;  %v143_v45 = vld [vmem:[%s453_s4 + $0x18] sm:$0xff]  ;;  %v317_v50 = vld [vmem:[%s452_s3] sm:$0xff]  ;;  %s278_s26 = sshll.u32 %s351_s25, 4  ;;  %s280_s29 = sshll.u32 %s456_s7, 4  ;;  %s279_s26 = int_to_ptr.vmem [resolvable:$true] %s278_s26  ;;  %s281_s29 = int_to_ptr.hbm [resolvable:$true] %s280_s29 }
   0x8   :  { %v316_v15 = vld [vmem:[%s450_s1 + $0x8] sm:$0xff]  ;;  %156 = vperm.xlu2 %323, %v142_v25   ;;  %v232_v51 = vld [vmem:[%s455_s6] sm:$0xf] }
   0x9   :  { %v318_v52 = vld [vmem:[%s452_s3 + $0x8] sm:$0xff] }
   0xa   :  { %297 = vmatmul.msk.bf16.vlgmr.msra.gmra.mxu0 %vm72_vm1, %v315_v10  ;;  %299 = vmatmul.msk.bf16.vlgmr.msra.gmra.mxu1 %vm72_vm1, %v315_v10 }
   0xb   :  { %54 = vperm.xlu0 %321, %v36_v11   ;;  %44 = vperm.xlu1 %322, %v34_v12  }
  0x10   :  { %161 = vperm.xlu2 %323, %v143_v45  }
  0x13   :  { %146 = vperm.xlu0 %321, %v140_v13   ;;  %151 = vperm.xlu1 %322, %v141_v14  }
  0x18   :  { %235 = vperm.xlu2 %323, %v232_v51  }
  0x1a   :  { %298 = vmatmul.msk.bf16.gmra.mxu0 %vm72_vm1, %v316_v15  ;;  %300 = vmatmul.msk.bf16.gmra.mxu1 %vm72_vm1, %v316_v15 }
  0x62   :  { %v157_v57 = vpop.permute.xlu2 %156 }
  0x6a   :  { %v162_v61 = vpop.permute.xlu2 %161 }
  0x74   :  { %v50_v21 = vpop.permute.xlu0 %49 }
  0x75   :  { %v40_v20 = vpop.permute.xlu1 %39 }
  0x7d   :  { %v45_v24 = vpop.permute.xlu1 %44  ;;  %v55_v26 = vpop.permute.xlu0 %54 }
  0x85   :  { %v152_v60 = vpop.permute.xlu1 %151  ;;  %v147_v2 = vpop.permute.xlu0 %146 }
  0x87   :  { %v95_v16 = vpop.f32.mrf.mxu0  ;;  %v114_v17 = vpop.f32.mrf.mxu1 }
  0x88   :  { %v96_v35 = vadd.f32 %v95_v16, %v40_v20  ;;  %v115_v36 = vadd.f32 %v114_v17, %v40_v20 }
  0x8a   :  { %v124_v46 = vmax.f32 %v96_v35, 0.0  ;;  %v125_v47 = vmax.f32 %v115_v36, 0.0 }
  0x8f   :  { %v97_v18 = vpop.f32.mrf.mxu0  ;;  %v116_v19 = vpop.f32.mrf.mxu1 }
  0x90   :  { %v98_v31 = vadd.f32 %v97_v18, %v45_v24  ;;  %v117_v32 = vadd.f32 %v116_v19, %v45_v24 }
  0x92   :  { %v126_v41 = vmax.f32 %v98_v31, 0.0  ;;  %v127_v42 = vmax.f32 %v117_v32, 0.0 }
  0x94   :  { %v136_v48 = vpack.c.bf16 %v126_v41, %v124_v46  ;;  %v137_v49 = vpack.c.bf16 %v127_v42, %v125_v47 }
  0x97   :  { %v100_v22 = vpop.f32.mrf.mxu0  ;;  %v119_v23 = vpop.f32.mrf.mxu1 }
  0x98   :  { %v101_v27 = vadd.f32 %v100_v22, %v50_v21  ;;  %v120_v28 = vadd.f32 %v119_v23, %v50_v21  ;;  %v227_v21 = vld [vmem:[%s454_s5] sm:$0x3]  ;;  %v236_v22 = vpop.permute.xlu2 %235 }
  0x9a   :  { %v128_v37 = vmax.f32 %v101_v27, 0.0  ;;  %v129_v38 = vmax.f32 %v120_v28, 0.0 }
  0x9f   :  { %v102_v29 = vpop.f32.mrf.mxu0  ;;  %v121_v30 = vpop.f32.mrf.mxu1 }
  0xa0   :  { %v103_v33 = vadd.f32 %v102_v29, %v55_v26  ;;  %v122_v34 = vadd.f32 %v121_v30, %v55_v26 }
  0xa2   :  { %v130_v39 = vmax.f32 %v103_v33, 0.0  ;;  %v131_v40 = vmax.f32 %v122_v34, 0.0 }
  0xa4   :  { %v138_v43 = vpack.c.bf16 %v130_v39, %v128_v37  ;;  %v139_v44 = vpack.c.bf16 %v131_v40, %v129_v38 }
  0xa6   :  { %187 = vmatpush.bf16.msra.mxu2 %v138_v43  ;;  %206 = vmatpush.bf16.msra.mxu3 %v139_v44 }
  0xaa   :  { %188 = vmatpush.bf16.msra.mxu2 %v136_v48  ;;  %207 = vmatpush.bf16.msra.mxu3 %v137_v49 }
  0xad   :  { %309 = vmatmul.msk.bf16.vlgmr.msra.gmra.mxu2 %vm174_vm2, %v317_v50  ;;  %311 = vmatmul.msk.bf16.vlgmr.msra.gmra.mxu3 %vm174_vm2, %v317_v50 }
  0xbd   :  { %310 = vmatmul.msk.bf16.gmra.mxu2 %vm174_vm2, %v318_v52  ;;  %312 = vmatmul.msk.bf16.gmra.mxu3 %vm174_vm2, %v318_v52 }
 0x130   :  { %v190_v53 = vpop.f32.mrf.mxu2  ;;  %v209_v54 = vpop.f32.mrf.mxu3 }
 0x131   :  { %v191_v7 = vadd.f32 %v190_v53, %v147_v2  ;;  %v210_v8 = vadd.f32 %v209_v54, %v147_v2 }
 0x133   :  { %v219_v17 = vmax.f32 %v191_v7, 0.0  ;;  %v220_v18 = vmax.f32 %v210_v8, 0.0 }
 0x138   :  { %v192_v55 = vpop.f32.mrf.mxu2  ;;  %v211_v56 = vpop.f32.mrf.mxu3 }
 0x139   :  { %v193_v3 = vadd.f32 %v192_v55, %v152_v60  ;;  %v212_v4 = vadd.f32 %v211_v56, %v152_v60 }
 0x13b   :  { %v221_v13 = vmax.f32 %v193_v3, 0.0  ;;  %v222_v14 = vmax.f32 %v212_v4, 0.0 }
 0x13d   :  { %v228_v19 = vpack.c.bf16 %v221_v13, %v219_v17  ;;  %v229_v20 = vpack.c.bf16 %v222_v14, %v220_v18 }
 0x140   :  { %v195_v58 = vpop.f32.mrf.mxu2  ;;  %v214_v59 = vpop.f32.mrf.mxu3 }
 0x141   :  { %v196_v62 = vadd.f32 %v195_v58, %v157_v57  ;;  %v215_v63 = vadd.f32 %v214_v59, %v157_v57 }
 0x143   :  { %v223_v9 = vmax.f32 %v196_v62, 0.0  ;;  %v224_v10 = vmax.f32 %v215_v63, 0.0 }
 0x148   :  { %v197_v0 = vpop.f32.mrf.mxu2  ;;  %v216_v1 = vpop.f32.mrf.mxu3 }
 0x149   :  { %v198_v5 = vadd.f32 %v197_v0, %v162_v61  ;;  %v217_v6 = vadd.f32 %v216_v1, %v162_v61 }
 0x14b   :  { %v225_v11 = vmax.f32 %v198_v5, 0.0  ;;  %v226_v12 = vmax.f32 %v217_v6, 0.0 }
 0x14d   :  { %v230_v15 = vpack.c.bf16 %v225_v11, %v223_v9  ;;  %v231_v16 = vpack.c.bf16 %v226_v12, %v224_v10 }
 0x14f   :  { %247 = vmatpush.bf16.msrb.mxu0 %v230_v15  ;;  %260 = vmatpush.bf16.msrb.mxu1 %v231_v16 }
 0x153   :  { %248 = vmatpush.bf16.msrb.mxu0 %v228_v19  ;;  %261 = vmatpush.bf16.msrb.mxu1 %v229_v20 }
 0x156   :  { %313 = vmatmul.msk.bf16.vlgmr.msrb.gmra.mxu0 %vm174_vm2, %v227_v21  ;;  %314 = vmatmul.msk.bf16.vlgmr.msrb.gmra.mxu1 %vm174_vm2, %v227_v21 }
 0x1d3   :  { %v250_v23 = vpop.f32.mrf.mxu0  ;;  %v263_v24 = vpop.f32.mrf.mxu1 }
 0x1d4   :  { %v264_v25 = vadd.f32 %v263_v24, %v236_v22  ;;  %v251_v26 = vadd.f32 %v250_v23, %v236_v22 }
 0x1d6   :  { %v269_v27 = vrot.slane %v264_v25, 4 }
 0x1d8   :  { %v270_v28 = vsel %vm79_vm0, %v251_v26, %v269_v27 }
 0x1d9   :  { %272 = vst [vmem:[#allocation2] sm:$0xff] %v270_v28 }
 0x1da   :  { %283 = dma.vmem_to_hbm [thread:$0]  %s279_s26, 128, %s281_s29, [#allocation3]  }
 0x1db   :  { %v252_v29 = vpop.f32.mrf.mxu0  ;;  %v265_v30 = vpop.f32.mrf.mxu1 }
 0x1dc   :  { %348 = dma.done.wait [#allocation3], 128  }
 0x1dd   :  { %349 = vsyncadd [#allocation3], 4294967168 }
 0x1de   :  { %288 = vsyncpa [#allocation3], 1 }

</bundles_post_ra>
